<compile_context>
chip_gen: v6e
topology: v6e:2x2x1
jax: 0.10.0
libtpu: 0.0.40
codegen_flags: <defaults>
</compile_context>

<pallas_src>
import functools

import numpy as np
import jax
import jax.numpy as jnp
from jax.experimental import pallas as pl
from jax.experimental.pallas import tpu as pltpu


def _round_up(x, m):
    return ((x + m - 1) // m) * m


def _vmem_capacity_bytes():
    try:
        return int(pltpu.get_tpu_info().vmem_capacity_bytes)
    except Exception:
        return 64 * 1024 * 1024  # conservative (v7x per-TC)


def cond_avg_kernel(x_ref, w_ref, b_ref, gmat_ref, gamma_ref, beta_ref, o_ref, *, approx_silu):
    C = o_ref.shape[-1]
    # Fused Linear + per-group mean: one 2C-wide MXU pass, f32 accumulation.
    tm = jnp.dot(x_ref[...], w_ref[...], preferred_element_type=jnp.float32) + b_ref[...]
    t = tm[:, :C]        # Linear output                  [TB, C]
    mean = tm[:, C:]     # per-group mean (per channel)   [TB, C]
    d = t - mean
    # Centered second moment via the group-averaging matrix; operand dtype follows gmat
    # (bf16 on the fast path, f32 on the exact path), accumulation always f32.
    dd = (d * d).astype(gmat_ref.dtype)
    var = jnp.dot(dd, gmat_ref[...], preferred_element_type=jnp.float32)
    y = d * jax.lax.rsqrt(var + 1e-5) * gamma_ref[...] + beta_ref[...]
    # SiLU: exp on the EUP, reciprocal on the EUP (approx only on the bf16 path).
    sig = pl.reciprocal(1.0 + jnp.exp(-y), approx=approx_silu)
    o_ref[...] = (y * sig).astype(o_ref.dtype)


def prepare_cond_avg_params(weight, bias, gamma, beta, num_groups=32,
                            linear_dtype=jnp.float32, stats_dtype=None):
    """One-time (weight-only) prep for cond_avg. Call once at parameter-load time.

    linear_dtype: MXU operand dtype for the Linear. bfloat16 is recommended on ALL TPU
    generations (v5e / v6e / v7x): f32 operands force a multi-pass matmul on every one of
    them, while accumulation stays f32 either way. Keep float32 for bit-exact module
    semantics.
    """
    K, C = weight.shape
    assert C % num_groups == 0
    gs = C // num_groups
    if stats_dtype is None:
        stats_dtype = jnp.bfloat16 if linear_dtype == jnp.bfloat16 else jnp.float32

    # Group-averaging matrix G[i, j] = 1/gs if group(i) == group(j) else 0.
    grp = np.arange(C) // gs
    gmat = jnp.asarray((grp[:, None] == grp[None, :]).astype(np.float32) / gs)

    # Quantize W once to the operand dtype, then form the mean block from the *quantized*
    # weights in f32, so t and its fused group-mean are consistent in the bf16 path.
    w_q = weight.astype(linear_dtype).astype(jnp.float32)
    w_aug = jnp.concatenate([w_q, w_q @ gmat], axis=1).astype(linear_dtype)   # [K, 2C]
    b = bias.astype(jnp.float32)
    b_aug = jnp.concatenate([b, b @ gmat]).reshape(1, 2 * C)                  # [1, 2C], f32

    return dict(
        w_aug=w_aug,
        b_aug=b_aug,
        gmat=gmat.astype(stats_dtype),   # 1/gs exact in bf16 for power-of-2 gs
        gamma=gamma.reshape(1, C).astype(jnp.float32),
        beta=beta.reshape(1, C).astype(jnp.float32),
        linear_dtype=linear_dtype,
        num_groups=num_groups,
    )


def cond_avg(cond, params, *, tile_b=512, out_dtype=jnp.float32, approx_silu=None):
    """cond: [N, window_size, emb_size] -> [N, cond_embed_dim].

    out_dtype=bfloat16 is recommended whenever the downstream diffusion model accepts it
    (halves output HBM bytes; the store is the binding resource on v5e/v6e at large N).
    GroupNorm math stays f32 in-kernel regardless; only the final store is cast.
    """
    N, W, E = cond.shape
    K = W * E
    w_aug = params["w_aug"]
    C = w_aug.shape[1] // 2
    linear_dtype = params["linear_dtype"]
    if approx_silu is None:
        approx_silu = (out_dtype == jnp.bfloat16)

    # Sublane multiple: bf16 tiles pack 2 rows per sublane -> keep tiles 16-row aligned.
    sub = 16 if (linear_dtype == jnp.bfloat16 or out_dtype == jnp.bfloat16) else 8

    n_pad_min = _round_up(max(N, 1), sub)
    tb = max(sub, min(_round_up(int(tile_b), sub), n_pad_min))
    # Keep >= 2 grid steps whenever there are enough rows so the "parallel" batch axis
    # actually shards across both v7x TensorCores and the x/out DMAs overlap compute.
    if n_pad_min >= 2 * sub:
        tb = min(tb, max((n_pad_min // 2) // sub * sub, sub))

    Np = _round_up(N, tb)
    x = cond.reshape(N, K)  # Flatten(-2, -1); K and C are the lane dims everywhere.
    if Np != N:
        # Zero rows are numerically safe: var=0 flows through rsqrt(var + eps).
        x = jnp.pad(x, ((0, Np - N), (0, 0)))
    x = x.astype(linear_dtype)

    it_in = np.dtype(linear_dtype).itemsize
    it_out = np.dtype(out_dtype).itemsize
    it_st = np.dtype(params["gmat"].dtype).itemsize
    est = (2 * tb * K * it_in                 # double-buffered x tiles
           + 2 * K * 2 * C * it_in            # fused weight (budgeted at 2 bufs for safety)
           + 2 * C * C * it_st                # group-averaging matrix
           + 2 * tb * C * it_out              # double-buffered output tiles
           + 2 * 8 * 4 * C * 4                # bias/gamma/beta rows (sublane-padded)
           + 6 * tb * 2 * C * 4)              # in-kernel f32 temporaries (tm, d, dd, var, y, sig)
    vmem_limit = int(min(max(2 * est, 16 * 1024 * 1024),
                         (_vmem_capacity_bytes() * 3) // 4))

    kernel = functools.partial(cond_avg_kernel, approx_silu=bool(approx_silu))

    def _run(single_buffer_invariants):
        def inv_spec(shape):
            idx = (lambda i: (0,) * len(shape))
            if single_buffer_invariants:
                # Grid-invariant operands: the second pipeline buffer is pure VMEM waste.
                return pl.BlockSpec(shape, idx, pipeline_mode=pl.Buffered(1))
            return pl.BlockSpec(shape, idx)

        return pl.pallas_call(
            kernel,
            out_shape=jax.ShapeDtypeStruct((Np, C), out_dtype),
            grid_spec=pl.GridSpec(
                grid=(Np // tb,),
                in_specs=[
                    pl.BlockSpec((tb, K), lambda i: (i, 0)),   # x tile
                    inv_spec((K, 2 * C)),                      # fused weight (resident)
                    inv_spec((1, 2 * C)),                      # fused bias
                    inv_spec((C, C)),                          # group-avg matrix
                    inv_spec((1, C)),                          # gamma
                    inv_spec((1, C)),                          # beta
                ],
                out_specs=pl.BlockSpec((tb, C), lambda i: (i, 0)),
            ),
            compiler_params=pltpu.CompilerParams(
                dimension_semantics=("parallel",),   # batch axis -> both TCs on v7x
                vmem_limit_bytes=vmem_limit,
            ),
        )(x, w_aug, params["b_aug"], params["gmat"], params["gamma"], params["beta"])

    try:
        out = _run(True)
    except Exception:
        # Fallback if this jax version rejects pipeline_mode / Buffered(1).
        out = _run(False)
    return out[:N]


def cond_avg_reference(cond, weight, bias, gamma, beta, num_groups=32):
    N, W, E = cond.shape
    C = weight.shape[1]
    gs = C // num_groups
    x = cond.reshape(N, W * E)
    t = x @ weight + bias
    tg = t.reshape(N, num_groups, gs)
    mean = tg.mean(axis=-1, keepdims=True)
    var = tg.var(axis=-1, keepdims=True)
    yn = ((tg - mean) / jnp.sqrt(var + 1e-5)).reshape(N, C)
    y = yn * gamma + beta
    return y * jax.nn.sigmoid(y)


if __name__ == "__main__":
    # Small config consistent with the module:
    #   emb_size (cfg.emb_length) = 16, window_size = 8, cond_embed_dim = 128
    #   batch_size = 2, seq_len = 32  ->  N = batch * (seq_len // window_size) = 8
    emb_size = 16
    window_size = 8
    cond_embed_dim = 128
    batch_size, seq_len = 2, 32
    N = batch_size * (seq_len // window_size)
    K = emb_size * window_size

    key = jax.random.PRNGKey(0)
    k1, k2, k3 = jax.random.split(key, 3)

    # speaker embedding reshaped to [N, window_size, emb_size] (output of self.encode)
    cond = jax.random.normal(k1, (N, window_size, emb_size), dtype=jnp.float32)

    # Deterministic parameter init (nn.Linear-like); GroupNorm affine = identity.
    bound = 1.0 / np.sqrt(K)
    weight = jax.random.uniform(k2, (K, cond_embed_dim), minval=-bound, maxval=bound,
                                dtype=jnp.float32)
    bias = jax.random.uniform(k3, (cond_embed_dim,), minval=-bound, maxval=bound,
                              dtype=jnp.float32)
    gamma = jnp.ones((cond_embed_dim,), jnp.float32)
    beta = jnp.zeros((cond_embed_dim,), jnp.float32)

    # Weight-only prep, hoisted out of the per-forward path.
    params_f32 = prepare_cond_avg_params(weight, bias, gamma, beta)                      # exact
    params_bf16 = prepare_cond_avg_params(weight, bias, gamma, beta,
                                          linear_dtype=jnp.bfloat16)                     # fast

    ref = cond_avg_reference(cond, weight, bias, gamma, beta)

    # 1) f32 path (exact module semantics), tiny N -> single grid step.
    out = jax.block_until_ready(cond_avg(cond, params_f32))
    np.testing.assert_allclose(np.asarray(out), np.asarray(ref), rtol=1e-5, atol=1e-5)

    # 2) Padding + multi-step grid path (N=20, tile_b=16 -> tb clamped to 8, pad to 24, grid=(3,)).
    cond20 = jax.random.normal(jax.random.PRNGKey(1), (20, window_size, emb_size),
                               dtype=jnp.float32)
    out20 = jax.block_until_ready(cond_avg(cond20, params_f32, tile_b=16))
    ref20 = cond_avg_reference(cond20, weight, bias, gamma, beta)
    np.testing.assert_allclose(np.asarray(out20), np.asarray(ref20), rtol=1e-5, atol=1e-5)

    # 3) bf16 fast path (recommended on v5e/v6e/v7x): bf16 Linear + bf16 variance matmul +
    #    bf16 output store + approx-EUP sigmoid. N=1024 exercises tb=512, grid=(2,).
    cond_big = jax.random.normal(jax.random.PRNGKey(2), (1024, window_size, emb_size),
                                 dtype=jnp.float32)
    out_big = jax.block_until_ready(
        cond_avg(cond_big, params_bf16, out_dtype=jnp.bfloat16))
    ref_big = cond_avg_reference(cond_big, weight, bias, gamma, beta)
    np.testing.assert_allclose(np.asarray(out_big, dtype=np.float32), np.asarray(ref_big),
                               rtol=1e-1, atol=1e-1)

    print("KERNEL_OK")
</pallas_src>

<mosaic_0001>
module attributes {stable_mosaic.version = 11 : i64} {
  func.func @cond_avg_kernel(%arg0: i32, %arg1: memref<8x128xf32, #tpu.memory_space<vmem>>, %arg2: memref<128x256xf32, #tpu.memory_space<vmem>>, %arg3: memref<1x256xf32, #tpu.memory_space<vmem>>, %arg4: memref<128x128xf32, #tpu.memory_space<vmem>>, %arg5: memref<1x128xf32, #tpu.memory_space<vmem>>, %arg6: memref<1x128xf32, #tpu.memory_space<vmem>>, %arg7: memref<8x128xf32, #tpu.memory_space<vmem>>) attributes {dimension_semantics = [#tpu.dimension_semantics<parallel>], iteration_bounds = array<i64: 1>, scalar_prefetch = 0 : i64, scratch_operands = 0 : i64, tpu.core_type = #tpu.core_type<tc>, window_params = [{transform_indices = @transform_0, window_bounds = array<i64: 8, 128>}, {pipeline_mode = #tpu.pipeline_mode<synchronous>, transform_indices = @transform_1, window_bounds = array<i64: 128, 256>}, {pipeline_mode = #tpu.pipeline_mode<synchronous>, transform_indices = @transform_2, window_bounds = array<i64: 1, 256>}, {pipeline_mode = #tpu.pipeline_mode<synchronous>, transform_indices = @transform_3, window_bounds = array<i64: 128, 128>}, {pipeline_mode = #tpu.pipeline_mode<synchronous>, transform_indices = @transform_4, window_bounds = array<i64: 1, 128>}, {pipeline_mode = #tpu.pipeline_mode<synchronous>, transform_indices = @transform_5, window_bounds = array<i64: 1, 128>}, {transform_indices = @transform_6, window_bounds = array<i64: 8, 128>}]} {
    %c0 = arith.constant 0 : index
    %c0_0 = arith.constant 0 : index
    %0 = vector.load %arg1[%c0, %c0_0] : memref<8x128xf32, #tpu.memory_space<vmem>>, vector<8x128xf32>
    %c0_1 = arith.constant 0 : index
    %c0_2 = arith.constant 0 : index
    %1 = vector.load %arg2[%c0_1, %c0_2] : memref<128x256xf32, #tpu.memory_space<vmem>>, vector<128x256xf32>
    %cst = arith.constant dense<0.000000e+00> : vector<8x256xf32>
    %2 = tpu.matmul %0, %1, %cst {dimension_numbers = #tpu.dot_dimension_numbers<[1], [0], [0], [1], [0, 0, 1, 1], [], []>} : vector<8x128xf32>, vector<128x256xf32>, vector<8x256xf32> -> vector<8x256xf32>
    %c0_3 = arith.constant 0 : index
    %c0_4 = arith.constant 0 : index
    %3 = vector.load %arg3[%c0_3, %c0_4] : memref<1x256xf32, #tpu.memory_space<vmem>>, vector<1x256xf32>
    %4 = vector.broadcast %3 : vector<1x256xf32> to vector<8x256xf32>
    %5 = arith.addf %2, %4 : vector<8x256xf32>
    %6 = vector.extract_strided_slice %5 {offsets = [0, 0], sizes = [8, 128], strides = [1, 1]} : vector<8x256xf32> to vector<8x128xf32>
    %7 = vector.extract_strided_slice %5 {offsets = [0, 128], sizes = [8, 128], strides = [1, 1]} : vector<8x256xf32> to vector<8x128xf32>
    %8 = arith.subf %6, %7 : vector<8x128xf32>
    %9 = arith.mulf %8, %8 : vector<8x128xf32>
    %c0_5 = arith.constant 0 : index
    %c0_6 = arith.constant 0 : index
    %10 = vector.load %arg4[%c0_5, %c0_6] : memref<128x128xf32, #tpu.memory_space<vmem>>, vector<128x128xf32>
    %cst_7 = arith.constant dense<0.000000e+00> : vector<8x128xf32>
    %11 = tpu.matmul %9, %10, %cst_7 {dimension_numbers = #tpu.dot_dimension_numbers<[1], [0], [0], [1], [0, 0, 1, 1], [], []>} : vector<8x128xf32>, vector<128x128xf32>, vector<8x128xf32> -> vector<8x128xf32>
    %cst_8 = arith.constant 9.99999974E-6 : f32
    %12 = vector.broadcast %cst_8 : f32 to vector<8x128xf32>
    %13 = arith.addf %11, %12 : vector<8x128xf32>
    %14 = math.rsqrt %13 : vector<8x128xf32>
    %15 = arith.mulf %8, %14 : vector<8x128xf32>
    %c0_9 = arith.constant 0 : index
    %c0_10 = arith.constant 0 : index
    %16 = vector.load %arg5[%c0_9, %c0_10] : memref<1x128xf32, #tpu.memory_space<vmem>>, vector<1x128xf32>
    %17 = vector.broadcast %16 : vector<1x128xf32> to vector<8x128xf32>
    %18 = arith.mulf %15, %17 : vector<8x128xf32>
    %c0_11 = arith.constant 0 : index
    %c0_12 = arith.constant 0 : index
    %19 = vector.load %arg6[%c0_11, %c0_12] : memref<1x128xf32, #tpu.memory_space<vmem>>, vector<1x128xf32>
    %20 = vector.broadcast %19 : vector<1x128xf32> to vector<8x128xf32>
    %21 = arith.addf %18, %20 : vector<8x128xf32>
    %cst_13 = arith.constant 0.000000e+00 : f32
    %22 = vector.broadcast %cst_13 : f32 to vector<8x128xf32>
    %23 = arith.subf %22, %21 : vector<8x128xf32>
    %24 = math.exp %23 : vector<8x128xf32>
    %cst_14 = arith.constant 1.000000e+00 : f32
    %25 = vector.broadcast %cst_14 : f32 to vector<8x128xf32>
    %26 = arith.addf %25, %24 : vector<8x128xf32>
    %27 = tpu.reciprocal %26 : vector<8x128xf32> -> vector<8x128xf32>
    %28 = arith.mulf %21, %27 : vector<8x128xf32>
    %c0_15 = arith.constant 0 : index
    %c0_16 = arith.constant 0 : index
    %29 = vector.load %arg7[%c0_15, %c0_16] : memref<8x128xf32, #tpu.memory_space<vmem>>, vector<8x128xf32>
    tpu.vector_store %arg7[%c0_15, %c0_16], %28 {strides = array<i32>} : memref<8x128xf32, #tpu.memory_space<vmem>>, vector<8x128xf32>,
    return
  }
  func.func @transform_0(%arg0: i32) -> (i32, i32) {
    %c0_i32 = arith.constant 0 : i32
    %c0_i32_0 = arith.constant 0 : i32
    return %arg0, %c0_i32 : i32, i32
  }
  func.func @transform_1(%arg0: i32) -> (i32, i32) {
    %c0_i32 = arith.constant 0 : i32
    %c0_i32_0 = arith.constant 0 : i32
    %c0_i32_1 = arith.constant 0 : i32
    return %c0_i32, %c0_i32_0 : i32, i32
  }
  func.func @transform_2(%arg0: i32) -> (i32, i32) {
    %c0_i32 = arith.constant 0 : i32
    %c0_i32_0 = arith.constant 0 : i32
    %c0_i32_1 = arith.constant 0 : i32
    return %c0_i32, %c0_i32_0 : i32, i32
  }
  func.func @transform_3(%arg0: i32) -> (i32, i32) {
    %c0_i32 = arith.constant 0 : i32
    %c0_i32_0 = arith.constant 0 : i32
    %c0_i32_1 = arith.constant 0 : i32
    return %c0_i32, %c0_i32_0 : i32, i32
  }
  func.func @transform_4(%arg0: i32) -> (i32, i32) {
    %c0_i32 = arith.constant 0 : i32
    %c0_i32_0 = arith.constant 0 : i32
    %c0_i32_1 = arith.constant 0 : i32
    return %c0_i32, %c0_i32_0 : i32, i32
  }
  func.func @transform_5(%arg0: i32) -> (i32, i32) {
    %c0_i32 = arith.constant 0 : i32
    %c0_i32_0 = arith.constant 0 : i32
    %c0_i32_1 = arith.constant 0 : i32
    return %c0_i32, %c0_i32_0 : i32, i32
  }
  func.func @transform_6(%arg0: i32) -> (i32, i32) {
    %c0_i32 = arith.constant 0 : i32
    %c0_i32_0 = arith.constant 0 : i32
    return %arg0, %c0_i32 : i32, i32
  }
}

module attributes {stable_mosaic.version = 11 : i64} {
  func.func @cond_avg_kernel(%arg0: i32, %arg1: memref<8x128xf32, #tpu.memory_space<vmem>>, %arg2: memref<128x256xf32, #tpu.memory_space<vmem>>, %arg3: memref<1x256xf32, #tpu.memory_space<vmem>>, %arg4: memref<128x128xf32, #tpu.memory_space<vmem>>, %arg5: memref<1x128xf32, #tpu.memory_space<vmem>>, %arg6: memref<1x128xf32, #tpu.memory_space<vmem>>, %arg7: memref<8x128xf32, #tpu.memory_space<vmem>>) attributes {dimension_semantics = [#tpu.dimension_semantics<parallel>], iteration_bounds = array<i64: 1>, scalar_prefetch = 0 : i64, scratch_operands = 0 : i64, tpu.core_type = #tpu.core_type<tc>, window_params = [{transform_indices = @transform_0, window_bounds = array<i64: 8, 128>}, {pipeline_mode = #tpu.pipeline_mode<synchronous>, transform_indices = @transform_1, window_bounds = array<i64: 128, 256>}, {pipeline_mode = #tpu.pipeline_mode<synchronous>, transform_indices = @transform_2, window_bounds = array<i64: 1, 256>}, {pipeline_mode = #tpu.pipeline_mode<synchronous>, transform_indices = @transform_3, window_bounds = array<i64: 128, 128>}, {pipeline_mode = #tpu.pipeline_mode<synchronous>, transform_indices = @transform_4, window_bounds = array<i64: 1, 128>}, {pipeline_mode = #tpu.pipeline_mode<synchronous>, transform_indices = @transform_5, window_bounds = array<i64: 1, 128>}, {transform_indices = @transform_6, window_bounds = array<i64: 8, 128>}]} {
    %c0 = arith.constant 0 : index
    %c0_0 = arith.constant 0 : index
    %0 = vector.load %arg1[%c0, %c0_0] : memref<8x128xf32, #tpu.memory_space<vmem>>, vector<8x128xf32>
    %c0_1 = arith.constant 0 : index
    %c0_2 = arith.constant 0 : index
    %1 = vector.load %arg2[%c0_1, %c0_2] : memref<128x256xf32, #tpu.memory_space<vmem>>, vector<128x256xf32>
    %cst = arith.constant dense<0.000000e+00> : vector<8x256xf32>
    %2 = tpu.matmul %0, %1, %cst {dimension_numbers = #tpu.dot_dimension_numbers<[1], [0], [0], [1], [0, 0, 1, 1], [], []>} : vector<8x128xf32>, vector<128x256xf32>, vector<8x256xf32> -> vector<8x256xf32>
    %c0_3 = arith.constant 0 : index
    %c0_4 = arith.constant 0 : index
    %3 = vector.load %arg3[%c0_3, %c0_4] : memref<1x256xf32, #tpu.memory_space<vmem>>, vector<1x256xf32>
    %4 = vector.broadcast %3 : vector<1x256xf32> to vector<8x256xf32>
    %5 = arith.addf %2, %4 : vector<8x256xf32>
    %6 = vector.extract_strided_slice %5 {offsets = [0, 0], sizes = [8, 128], strides = [1, 1]} : vector<8x256xf32> to vector<8x128xf32>
    %7 = vector.extract_strided_slice %5 {offsets = [0, 128], sizes = [8, 128], strides = [1, 1]} : vector<8x256xf32> to vector<8x128xf32>
    %8 = arith.subf %6, %7 : vector<8x128xf32>
    %9 = arith.mulf %8, %8 : vector<8x128xf32>
    %c0_5 = arith.constant 0 : index
    %c0_6 = arith.constant 0 : index
    %10 = vector.load %arg4[%c0_5, %c0_6] : memref<128x128xf32, #tpu.memory_space<vmem>>, vector<128x128xf32>
    %cst_7 = arith.constant dense<0.000000e+00> : vector<8x128xf32>
    %11 = tpu.matmul %9, %10, %cst_7 {dimension_numbers = #tpu.dot_dimension_numbers<[1], [0], [0], [1], [0, 0, 1, 1], [], []>} : vector<8x128xf32>, vector<128x128xf32>, vector<8x128xf32> -> vector<8x128xf32>
    %cst_8 = arith.constant 9.99999974E-6 : f32
    %12 = vector.broadcast %cst_8 : f32 to vector<8x128xf32>
    %13 = arith.addf %11, %12 : vector<8x128xf32>
    %14 = math.rsqrt %13 : vector<8x128xf32>
    %15 = arith.mulf %8, %14 : vector<8x128xf32>
    %c0_9 = arith.constant 0 : index
    %c0_10 = arith.constant 0 : index
    %16 = vector.load %arg5[%c0_9, %c0_10] : memref<1x128xf32, #tpu.memory_space<vmem>>, vector<1x128xf32>
    %17 = vector.broadcast %16 : vector<1x128xf32> to vector<8x128xf32>
    %18 = arith.mulf %15, %17 : vector<8x128xf32>
    %c0_11 = arith.constant 0 : index
    %c0_12 = arith.constant 0 : index
    %19 = vector.load %arg6[%c0_11, %c0_12] : memref<1x128xf32, #tpu.memory_space<vmem>>, vector<1x128xf32>
    %20 = vector.broadcast %19 : vector<1x128xf32> to vector<8x128xf32>
    %21 = arith.addf %18, %20 : vector<8x128xf32>
    %cst_13 = arith.constant 0.000000e+00 : f32
    %22 = vector.broadcast %cst_13 : f32 to vector<8x128xf32>
    %23 = arith.subf %22, %21 : vector<8x128xf32>
    %24 = math.exp %23 : vector<8x128xf32>
    %cst_14 = arith.constant 1.000000e+00 : f32
    %25 = vector.broadcast %cst_14 : f32 to vector<8x128xf32>
    %26 = arith.addf %25, %24 : vector<8x128xf32>
    %27 = tpu.reciprocal %26 : vector<8x128xf32> -> vector<8x128xf32>
    %28 = arith.mulf %21, %27 : vector<8x128xf32>
    %c0_15 = arith.constant 0 : index
    %c0_16 = arith.constant 0 : index
    %29 = vector.load %arg7[%c0_15, %c0_16] : memref<8x128xf32, #tpu.memory_space<vmem>>, vector<8x128xf32>
    tpu.vector_store %arg7[%c0_15, %c0_16], %28 {strides = array<i32>} : memref<8x128xf32, #tpu.memory_space<vmem>>, vector<8x128xf32>,
    return
  }
  func.func @transform_0(%arg0: i32) -> (i32, i32) {
    %c0_i32 = arith.constant 0 : i32
    %c0_i32_0 = arith.constant 0 : i32
    return %arg0, %c0_i32 : i32, i32
  }
  func.func @transform_1(%arg0: i32) -> (i32, i32) {
    %c0_i32 = arith.constant 0 : i32
    %c0_i32_0 = arith.constant 0 : i32
    %c0_i32_1 = arith.constant 0 : i32
    return %c0_i32, %c0_i32_0 : i32, i32
  }
  func.func @transform_2(%arg0: i32) -> (i32, i32) {
    %c0_i32 = arith.constant 0 : i32
    %c0_i32_0 = arith.constant 0 : i32
    %c0_i32_1 = arith.constant 0 : i32
    return %c0_i32, %c0_i32_0 : i32, i32
  }
  func.func @transform_3(%arg0: i32) -> (i32, i32) {
    %c0_i32 = arith.constant 0 : i32
    %c0_i32_0 = arith.constant 0 : i32
    %c0_i32_1 = arith.constant 0 : i32
    return %c0_i32, %c0_i32_0 : i32, i32
  }
  func.func @transform_4(%arg0: i32) -> (i32, i32) {
    %c0_i32 = arith.constant 0 : i32
    %c0_i32_0 = arith.constant 0 : i32
    %c0_i32_1 = arith.constant 0 : i32
    return %c0_i32, %c0_i32_0 : i32, i32
  }
  func.func @transform_5(%arg0: i32) -> (i32, i32) {
    %c0_i32 = arith.constant 0 : i32
    %c0_i32_0 = arith.constant 0 : i32
    %c0_i32_1 = arith.constant 0 : i32
    return %c0_i32, %c0_i32_0 : i32, i32
  }
  func.func @transform_6(%arg0: i32) -> (i32, i32) {
    %c0_i32 = arith.constant 0 : i32
    %c0_i32_0 = arith.constant 0 : i32
    return %arg0, %c0_i32 : i32, i32
  }
}

</mosaic_0001>

<bundles_post_ra>
// kernel: tpu_custom_call.1
= control target key start
LH: loop header
LB: loop body
LE: loop exit
PB: predicated region body
PF: predicated region fallthrough
CT: control target
= control target key end

     0   :  { %11 = vsyncpa [#allocation3], 0  ;;  %s548_s0 = inlined_call_operand.hbm [shape: f32[8,128], index: 0, kind: input, shape index: {}]   ;;  %s549_s1 = inlined_call_operand.hbm [shape: f32[128,256], index: 1, kind: input, shape index: {}]   ;;  %s550_s2 = inlined_call_operand.vmem [shape: f32[1,256], index: 2, kind: input, shape index: {}]   ;;  %s551_s3 = inlined_call_operand.hbm [shape: f32[128,128], index: 3, kind: input, shape index: {}]   ;;  %s552_s4 = inlined_call_operand.vmem [shape: f32[1,128], index: 4, kind: input, shape index: {}]   ;;  %s553_s5 = inlined_call_operand.vmem [shape: f32[1,128], index: 5, kind: input, shape index: {}]   ;;  %s554_s6 = inlined_call_operand.hbm [shape: f32[8,128], index: 6, kind: output, shape index: {}]  }
   0x1   :  { %12 = vsyncpa [#allocation6], 0 }
   0x2   :  { %13 = vsyncpa [#allocation4], 0  ;;  %s464_s21 = smov [#allocation5]  }
   0x3   :  { %s29_s22 = sshll.u32 %s464_s21, 4  ;;  %s30_s22 = int_to_ptr.vmem [resolvable:$true] %s29_s22 }
   0x4   :  { %s386_s23 = scalar_lea.vmem %s30_s22, 4096  ;;  %p391_p1 = scmp.lt.s32.totalorder %s30_s22, %s30_s22 }
   0x5   :  { %p387_p0 = scmp.ne.s32.totalorder %s30_s22, %s386_s23  ;;  %p392_p2 = scmp.lt.s32.totalorder %s386_s23, %s386_s23 }
   0x7   :  { %p393_p3 = por %p392_p2, %p391_p1 }
   0x9   :  { %p394_p4 = pnand %p393_p3, %p387_p0 }
   0xb   :  { %397 = shalt.err (!%p394_p4)
}
   0xc   :  { %s465_s24 = smov 256   ;;  %s466_s25 = smov 16  }
   0xd   :  { %35 = dma.hbm_to_vmem [thread:$0]  %s549_s1, 4096, %s30_s22, [#allocation6], %s465_s24, %s465_s24, %s466_s25  }
   0xe   :  { %s467_s28 = smov [#allocation2]   ;;  %s468_s30 = smov [#allocation7]  }
   0xf   :  { %s20_s29 = sshll.u32 %s467_s28, 4  ;;  %s43_s7 = sshll.u32 %s468_s30, 4  ;;  %s21_s29 = int_to_ptr.vmem [resolvable:$true] %s20_s29  ;;  %s44_s7 = int_to_ptr.vmem [resolvable:$true] %s43_s7 }
  0x10   :  { %s406_s8 = scalar_lea.vmem %s21_s29, 128  ;;  %p411_p6 = scmp.lt.s32.totalorder %s21_s29, %s21_s29 }
  0x11   :  { %p407_p5 = scmp.ne.s32.totalorder %s21_s29, %s406_s8  ;;  %p412_p7 = scmp.lt.s32.totalorder %s406_s8, %s406_s8 }
  0x13   :  { %p413_p8 = por %p412_p7, %p411_p6 }
  0x15   :  { %p414_p9 = pnand %p413_p8, %p407_p5 }
  0x17   :  { %417 = shalt.err (!%p414_p9)
}
  0x18   :  { %23 = dma.hbm_to_vmem [thread:$0]  %s548_s0, 128, %s21_s29, [#allocation3]  }
  0x19   :  { %s426_s11 = scalar_lea.vmem %s44_s7, 2048  ;;  %p431_p11 = scmp.lt.s32.totalorder %s44_s7, %s44_s7 }
  0x1a   :  { %p427_p10 = scmp.ne.s32.totalorder %s44_s7, %s426_s11  ;;  %p432_p12 = scmp.lt.s32.totalorder %s426_s11, %s426_s11 }
  0x1c   :  { %p433_p13 = por %p432_p12, %p431_p11 }
  0x1e   :  { %p434_p0 = pnand %p433_p13, %p427_p10 }
  0x20   :  { %437 = shalt.err (!%p434_p0)
}
  0x21   :  { %s469_s1 = smov 128   ;;  %s470_s12 = smov 8  }
  0x22   :  { %49 = dma.hbm_to_vmem [thread:$0]  %s551_s3, 2048, %s44_s7, [#allocation6], %s469_s1, %s469_s1, %s470_s12  }
  0x23   :  { %458 = dma.done.wait [#allocation3], 128  }
  0x24   :  { %459 = vsyncadd [#allocation3], 4294967168 }
  0x25   :  { %460 = dma.done.wait [#allocation6], 6144  }
  0x26   :  { %461 = vsyncadd [#allocation6], 4294961152  ;;  %v471_v0 = vmov 0.0   ;;  %v95_v1 = vld [vmem:[#allocation5 + $0xf8] sm:$0xff]  ;;  %v94_v2 = vld [vmem:[#allocation5 + $0xf0] sm:$0xff]  ;;  %vm472_vm0 = vmmov 0   ;;  %v98_v50 = vlaneseq }
  0x27   :  { %172 = vmatprep.mubr.f32.mxu0 %v471_v0  ;;  %327 = vmatprep.subr.mxu1 %v471_v0  ;;  %v93_v3 = vld [vmem:[#allocation5 + $0xe8] sm:$0xff]  ;;  %v92_v4 = vld [vmem:[#allocation5 + $0xe0] sm:$0xff]  ;;  %v91_v5 = vld [vmem:[#allocation5 + $0xd8] sm:$0xff]  ;;  %s473_s18 = smov [#allocation8]  }
  0x28   :  { %108 = vmatprep.subr.mxu0 %v95_v1  ;;  %v90_v6 = vld [vmem:[#allocation5 + $0xd0] sm:$0xff]  ;;  %v89_v7 = vld [vmem:[#allocation5 + $0xc8] sm:$0xff]  ;;  %v88_v8 = vld [vmem:[#allocation5 + $0xc0] sm:$0xff]  ;;  %359 = vmatprep.mubr.msk.f32.mxu1 %vm472_vm0, %v471_v0  ;;  %v99_v51 = vshrl.u32 %v98_v50, 7  ;;  %s298_s19 = sshll.u32 %s473_s18, 4  ;;  %s299_s19 = int_to_ptr.vmem [resolvable:$true] %s298_s19 }
  0x29   :  { %109 = vmatpush1.msra.mxu0 %v94_v2  ;;  %v87_v9 = vld [vmem:[#allocation5 + $0xb8] sm:$0xff]  ;;  %v86_v10 = vld [vmem:[#allocation5 + $0xb0] sm:$0xff]  ;;  %v85_v11 = vld [vmem:[#allocation5 + $0xa8] sm:$0xff]  ;;  %p443_p2 = scmp.lt.s32.totalorder %s299_s19, %s299_s19 }
  0x2a   :  { %110 = vmatprep.subr.mxu0 %v93_v3  ;;  %v84_v12 = vld [vmem:[#allocation5 + $0xa0] sm:$0xff]  ;;  %v83_v13 = vld [vmem:[#allocation5 + $0x98] sm:$0xff]  ;;  %v82_v14 = vld [vmem:[#allocation5 + $0x90] sm:$0xff]  ;;  %v100_v52 = vsub.s32 0, %v99_v51  ;;  %v104_v53 = vsub.s32 1, %v99_v51 }
  0x2b   :  { %111 = vmatpush1.msra.mxu0 %v92_v4  ;;  %v196_v15 = vld [vmem:[#allocation7 + $0x78] sm:$0xff]  ;;  %v195_v16 = vld [vmem:[#allocation7 + $0x70] sm:$0xff]  ;;  %v81_v17 = vld [vmem:[#allocation5 + $0x88] sm:$0xff] }
  0x2c   :  { %112 = vmatprep.subr.mxu0 %v91_v5  ;;  %328 = vmatpush3.msra.mxu1 %v196_v15  ;;  %v80_v18 = vld [vmem:[#allocation5 + $0x80] sm:$0xff]  ;;  %v194_v19 = vld [vmem:[#allocation7 + $0x68] sm:$0xff]  ;;  %v79_v20 = vld [vmem:[#allocation5 + $0x78] sm:$0xff] }
  0x2d   :  { %113 = vmatpush1.msra.mxu0 %v90_v6  ;;  %329 = vmatprep.subr.mxu1 %v471_v0  ;;  %v78_v21 = vld [vmem:[#allocation5 + $0x70] sm:$0xff]  ;;  %v193_v22 = vld [vmem:[#allocation7 + $0x60] sm:$0xff]  ;;  %v77_v23 = vld [vmem:[#allocation5 + $0x68] sm:$0xff] }
  0x2e   :  { %114 = vmatprep.subr.mxu0 %v89_v7  ;;  %330 = vmatpush3.msra.mxu1 %v195_v16  ;;  %v76_v24 = vld [vmem:[#allocation5 + $0x60] sm:$0xff]  ;;  %v192_v25 = vld [vmem:[#allocation7 + $0x58] sm:$0xff]  ;;  %v74_v27 = vld [vmem:[#allocation5 + $0x50] sm:$0xff] }
  0x2f   :  { %115 = vmatpush1.msra.mxu0 %v88_v8  ;;  %331 = vmatprep.subr.mxu1 %v471_v0  ;;  %v75_v26 = vld [vmem:[#allocation5 + $0x58] sm:$0xff]  ;;  %v191_v28 = vld [vmem:[#allocation7 + $0x50] sm:$0xff]  ;;  %v73_v29 = vld [vmem:[#allocation5 + $0x48] sm:$0xff] }
  0x30   :  { %116 = vmatprep.subr.mxu0 %v87_v9  ;;  %332 = vmatpush3.msra.mxu1 %v194_v19  ;;  %v72_v30 = vld [vmem:[#allocation5 + $0x40] sm:$0xff]  ;;  %v190_v31 = vld [vmem:[#allocation7 + $0x48] sm:$0xff]  ;;  %v71_v32 = vld [vmem:[#allocation5 + $0x38] sm:$0xff] }
  0x31   :  { %117 = vmatpush1.msra.mxu0 %v86_v10  ;;  %333 = vmatprep.subr.mxu1 %v471_v0  ;;  %v70_v33 = vld [vmem:[#allocation5 + $0x30] sm:$0xff]  ;;  %v189_v34 = vld [vmem:[#allocation7 + $0x40] sm:$0xff]  ;;  %v69_v35 = vld [vmem:[#allocation5 + $0x28] sm:$0xff] }
  0x32   :  { %118 = vmatprep.subr.mxu0 %v85_v11  ;;  %334 = vmatpush3.msra.mxu1 %v193_v22  ;;  %v68_v36 = vld [vmem:[#allocation5 + $0x20] sm:$0xff]  ;;  %v188_v37 = vld [vmem:[#allocation7 + $0x38] sm:$0xff]  ;;  %v66_v39 = vld [vmem:[#allocation5 + $0x10] sm:$0xff] }
  0x33   :  { %119 = vmatpush1.msra.mxu0 %v84_v12  ;;  %335 = vmatprep.subr.mxu1 %v471_v0  ;;  %v67_v38 = vld [vmem:[#allocation5 + $0x18] sm:$0xff]  ;;  %v187_v40 = vld [vmem:[#allocation7 + $0x30] sm:$0xff]  ;;  %v65_v41 = vld [vmem:[#allocation5 + $0x8] sm:$0xff] }
  0x34   :  { %120 = vmatprep.subr.mxu0 %v83_v13  ;;  %336 = vmatpush3.msra.mxu1 %v192_v25  ;;  %v64_v42 = vld [vmem:[#allocation5] sm:$0xff]  ;;  %v186_v43 = vld [vmem:[#allocation7 + $0x28] sm:$0xff]  ;;  %v63_v44 = vld [vmem:[#allocation2] sm:$0xff] }
  0x35   :  { %121 = vmatpush1.msra.mxu0 %v82_v14  ;;  %337 = vmatprep.subr.mxu1 %v471_v0  ;;  %v185_v45 = vld [vmem:[#allocation7 + $0x20] sm:$0xff]  ;;  %v184_v46 = vld [vmem:[#allocation7 + $0x18] sm:$0xff]  ;;  %v183_v47 = vld [vmem:[#allocation7 + $0x10] sm:$0xff] }
  0x36   :  { %122 = vmatprep.subr.mxu0 %v81_v17  ;;  %338 = vmatpush3.msra.mxu1 %v191_v28  ;;  %v182_v48 = vld [vmem:[#allocation7 + $0x8] sm:$0xff]  ;;  %v181_v49 = vld [vmem:[#allocation7] sm:$0xff]  ;;  %v96_v54 = vld [vmem:[%s550_s2] sm:$0x3] }
  0x37   :  { %123 = vmatpush1.msra.mxu0 %v80_v18  ;;  %339 = vmatprep.subr.mxu1 %v471_v0  ;;  %v101_v55 = vrot.slane %v96_v54, %v100_v52  ;;  %v105_v56 = vrot.slane %v96_v54, %v104_v53  ;;  %v308_v3 = vld [vmem:[%s552_s4] ss:$0 sm:$0xff]  ;;  %s438_s4 = scalar_lea.vmem %s299_s19, 128 }
  0x38   :  { %124 = vmatprep.subr.mxu0 %v79_v20  ;;  %340 = vmatpush3.msra.mxu1 %v190_v31  ;;  %v309_v5 = vld [vmem:[%s553_s5] ss:$0 sm:$0xff]  ;;  %p439_p1 = scmp.ne.s32.totalorder %s299_s19, %s438_s4  ;;  %p444_p3 = scmp.lt.s32.totalorder %s438_s4, %s438_s4 }
  0x39   :  { %125 = vmatpush1.msra.mxu0 %v78_v21  ;;  %341 = vmatprep.subr.mxu1 %v471_v0 }
  0x3a   :  { %126 = vmatprep.subr.mxu0 %v77_v23  ;;  %342 = vmatpush3.msra.mxu1 %v189_v34  ;;  %p445_p4 = por %p444_p3, %p443_p2 }
  0x3b   :  { %127 = vmatpush1.msra.mxu0 %v76_v24  ;;  %343 = vmatprep.subr.mxu1 %v471_v0 }
  0x3c   :  { %128 = vmatprep.subr.mxu0 %v75_v26  ;;  %344 = vmatpush3.msra.mxu1 %v188_v37  ;;  %p446_p5 = pnand %p445_p4, %p439_p1 }
  0x3d   :  { %129 = vmatpush1.msra.mxu0 %v74_v27  ;;  %345 = vmatprep.subr.mxu1 %v471_v0 }
  0x3e   :  { %130 = vmatprep.subr.mxu0 %v73_v29  ;;  %346 = vmatpush3.msra.mxu1 %v187_v40 }
  0x3f   :  { %131 = vmatpush1.msra.mxu0 %v72_v30  ;;  %347 = vmatprep.subr.mxu1 %v471_v0 }
  0x40   :  { %132 = vmatprep.subr.mxu0 %v71_v32  ;;  %348 = vmatpush3.msra.mxu1 %v186_v43 }
  0x41   :  { %133 = vmatpush1.msra.mxu0 %v70_v33  ;;  %349 = vmatprep.subr.mxu1 %v471_v0 }
  0x42   :  { %134 = vmatprep.subr.mxu0 %v69_v35  ;;  %350 = vmatpush3.msra.mxu1 %v185_v45 }
  0x43   :  { %135 = vmatpush1.msra.mxu0 %v68_v36  ;;  %351 = vmatprep.subr.mxu1 %v471_v0 }
  0x44   :  { %136 = vmatprep.subr.mxu0 %v67_v38  ;;  %352 = vmatpush3.msra.mxu1 %v184_v46 }
  0x45   :  { %137 = vmatpush1.msra.mxu0 %v66_v39  ;;  %353 = vmatprep.subr.mxu1 %v471_v0 }
  0x46   :  { %138 = vmatprep.subr.mxu0 %v65_v41  ;;  %354 = vmatpush3.msra.mxu1 %v183_v47 }
  0x47   :  { %139 = vmatpush1.msra.mxu0 %v64_v42  ;;  %355 = vmatprep.subr.mxu1 %v471_v0 }
  0x48   :  { %173 = vmatmul.mubr.f32.vlgmr.msra.gmra.mxu0 %v63_v44  ;;  %356 = vmatpush3.msra.mxu1 %v182_v48 }
  0x49   :  { %357 = vmatprep.subr.mxu1 %v471_v0 }
  0x4a   :  { %358 = vmatpush3.msra.mxu1 %v181_v49 }
 0x108   :  { %v174_v57 = vpop.f32.mrf.mxu0 }
 0x109   :  { %v175_v59 = vadd.f32 %v174_v57, %v101_v55 }
 0x10a   :  { %v176_v58 = vpop.f32.mrf.mxu0 }
 0x10b   :  { %v177_v60 = vadd.f32 %v176_v58, %v105_v56 }
 0x10d   :  { %v179_v61 = vsub.f32 %v175_v59, %v177_v60 }
 0x10f   :  { %v180_v62 = vmul.f32 %v179_v61, %v179_v61 }
 0x111   :  { %360 = vmatmul.mubr.f32.vlgmr.msra.gmra.mxu1 %v180_v62 }
 0x1d1   :  { %v263_v63 = vpop.f32.mrf.mxu1 }
 0x1d2   :  { %v264_v0 = vadd.f32 1e-05, %v263_v63 }
 0x1d3   :  { %v361_v1 = vpop.f32.mrf.mxu1 }
 0x1d4   :  { %372 = vrsqrt.f32 %v264_v0 }
 0x1e1   :  { %v373_v2 = vpop.eup %372 }
 0x1e2   :  { %v268_v4 = vmul.f32 %v373_v2, %v179_v61 }
 0x1e4   :  { %v276_v6 = vmul.f32 %v308_v3, %v268_v4 }
 0x1e6   :  { %v284_v7 = vadd.f32 %v309_v5, %v276_v6 }
 0x1e8   :  { %v285_v8 = vsub.f32 0.0, %v284_v7 }
 0x1ea   :  { %v286_v9 = vmul.f32 1.442695, %v285_v8 }
 0x1ec   :  { %374 = vpow2.f32 %v286_v9 }
 0x1f9   :  { %v375_v10 = vpop.eup %374 }
 0x1fa   :  { %v288_v11 = vadd.f32 1.0, %v375_v10 }
 0x1fc   :  { %376 = vrcp.f32 %v288_v11 }
 0x209   :  { %v377_v12 = vpop.eup %376 }
 0x20a   :  { %v290_v13 = vmul.f32 %v377_v12, %v284_v7 }
 0x20c   :  { %291 = vst [vmem:[#allocation8] sm:$0xff] %v290_v13 }
 0x20d   :  { %449 = shalt.err (!%p446_p5)
}
 0x20e   :  { %301 = dma.vmem_to_hbm [thread:$0]  %s299_s19, 128, %s554_s6, [#allocation4]  }
 0x20f   :  { %462 = dma.done.wait [#allocation4], 128  }
 0x210   :  { %463 = vsyncadd [#allocation4], 4294967168 }
 0x211   :  { %305 = vsyncpa [#allocation3], 1 }
 0x212   :  { %306 = vsyncpa [#allocation6], 1 }
 0x213   :  { %307 = vsyncpa [#allocation4], 1 }

// kernel: tpu_custom_call.1
= control target key start
LH: loop header
LB: loop body
LE: loop exit
PB: predicated region body
PF: predicated region fallthrough
CT: control target
= control target key end

     0   :  { %11 = vsyncpa [#allocation3], 0  ;;  %s548_s0 = inlined_call_operand.hbm [shape: f32[8,128], index: 0, kind: input, shape index: {}]   ;;  %s549_s1 = inlined_call_operand.hbm [shape: f32[128,256], index: 1, kind: input, shape index: {}]   ;;  %s550_s2 = inlined_call_operand.vmem [shape: f32[1,256], index: 2, kind: input, shape index: {}]   ;;  %s551_s3 = inlined_call_operand.hbm [shape: f32[128,128], index: 3, kind: input, shape index: {}]   ;;  %s552_s4 = inlined_call_operand.vmem [shape: f32[1,128], index: 4, kind: input, shape index: {}]   ;;  %s553_s5 = inlined_call_operand.vmem [shape: f32[1,128], index: 5, kind: input, shape index: {}]   ;;  %s554_s6 = inlined_call_operand.hbm [shape: f32[8,128], index: 6, kind: output, shape index: {}]  }
   0x1   :  { %12 = vsyncpa [#allocation6], 0 }
   0x2   :  { %13 = vsyncpa [#allocation4], 0  ;;  %s464_s21 = smov [#allocation5]  }
   0x3   :  { %s29_s22 = sshll.u32 %s464_s21, 4  ;;  %s30_s22 = int_to_ptr.vmem [resolvable:$true] %s29_s22 }
   0x4   :  { %s386_s23 = scalar_lea.vmem %s30_s22, 4096  ;;  %p391_p1 = scmp.lt.s32.totalorder %s30_s22, %s30_s22 }
   0x5   :  { %p387_p0 = scmp.ne.s32.totalorder %s30_s22, %s386_s23  ;;  %p392_p2 = scmp.lt.s32.totalorder %s386_s23, %s386_s23 }
   0x7   :  { %p393_p3 = por %p392_p2, %p391_p1 }
   0x9   :  { %p394_p4 = pnand %p393_p3, %p387_p0 }
   0xb   :  { %397 = shalt.err (!%p394_p4)
}
   0xc   :  { %s465_s24 = smov 256   ;;  %s466_s25 = smov 16  }
   0xd   :  { %35 = dma.hbm_to_vmem [thread:$0]  %s549_s1, 4096, %s30_s22, [#allocation6], %s465_s24, %s465_s24, %s466_s25  }
   0xe   :  { %s467_s28 = smov [#allocation2]   ;;  %s468_s30 = smov [#allocation7]  }
   0xf   :  { %s20_s29 = sshll.u32 %s467_s28, 4  ;;  %s43_s7 = sshll.u32 %s468_s30, 4  ;;  %s21_s29 = int_to_ptr.vmem [resolvable:$true] %s20_s29  ;;  %s44_s7 = int_to_ptr.vmem [resolvable:$true] %s43_s7 }
  0x10   :  { %s406_s8 = scalar_lea.vmem %s21_s29, 128  ;;  %p411_p6 = scmp.lt.s32.totalorder %s21_s29, %s21_s29 }
  0x11   :  { %p407_p5 = scmp.ne.s32.totalorder %s21_s29, %s406_s8  ;;  %p412_p7 = scmp.lt.s32.totalorder %s406_s8, %s406_s8 }
  0x13   :  { %p413_p8 = por %p412_p7, %p411_p6 }
  0x15   :  { %p414_p9 = pnand %p413_p8, %p407_p5 }
  0x17   :  { %417 = shalt.err (!%p414_p9)
}
  0x18   :  { %23 = dma.hbm_to_vmem [thread:$0]  %s548_s0, 128, %s21_s29, [#allocation3]  }
  0x19   :  { %s426_s11 = scalar_lea.vmem %s44_s7, 2048  ;;  %p431_p11 = scmp.lt.s32.totalorder %s44_s7, %s44_s7 }
  0x1a   :  { %p427_p10 = scmp.ne.s32.totalorder %s44_s7, %s426_s11  ;;  %p432_p12 = scmp.lt.s32.totalorder %s426_s11, %s426_s11 }
  0x1c   :  { %p433_p13 = por %p432_p12, %p431_p11 }
  0x1e   :  { %p434_p0 = pnand %p433_p13, %p427_p10 }
  0x20   :  { %437 = shalt.err (!%p434_p0)
}
  0x21   :  { %s469_s1 = smov 128   ;;  %s470_s12 = smov 8  }
  0x22   :  { %49 = dma.hbm_to_vmem [thread:$0]  %s551_s3, 2048, %s44_s7, [#allocation6], %s469_s1, %s469_s1, %s470_s12  }
  0x23   :  { %458 = dma.done.wait [#allocation3], 128  }
  0x24   :  { %459 = vsyncadd [#allocation3], 4294967168 }
  0x25   :  { %460 = dma.done.wait [#allocation6], 6144  }
  0x26   :  { %461 = vsyncadd [#allocation6], 4294961152  ;;  %v471_v0 = vmov 0.0   ;;  %v95_v1 = vld [vmem:[#allocation5 + $0xf8] sm:$0xff]  ;;  %v94_v2 = vld [vmem:[#allocation5 + $0xf0] sm:$0xff]  ;;  %vm472_vm0 = vmmov 0   ;;  %v98_v50 = vlaneseq }
  0x27   :  { %172 = vmatprep.mubr.f32.mxu0 %v471_v0  ;;  %327 = vmatprep.subr.mxu1 %v471_v0  ;;  %v93_v3 = vld [vmem:[#allocation5 + $0xe8] sm:$0xff]  ;;  %v92_v4 = vld [vmem:[#allocation5 + $0xe0] sm:$0xff]  ;;  %v91_v5 = vld [vmem:[#allocation5 + $0xd8] sm:$0xff]  ;;  %s473_s18 = smov [#allocation8]  }
  0x28   :  { %108 = vmatprep.subr.mxu0 %v95_v1  ;;  %v90_v6 = vld [vmem:[#allocation5 + $0xd0] sm:$0xff]  ;;  %v89_v7 = vld [vmem:[#allocation5 + $0xc8] sm:$0xff]  ;;  %v88_v8 = vld [vmem:[#allocation5 + $0xc0] sm:$0xff]  ;;  %359 = vmatprep.mubr.msk.f32.mxu1 %vm472_vm0, %v471_v0  ;;  %v99_v51 = vshrl.u32 %v98_v50, 7  ;;  %s298_s19 = sshll.u32 %s473_s18, 4  ;;  %s299_s19 = int_to_ptr.vmem [resolvable:$true] %s298_s19 }
  0x29   :  { %109 = vmatpush1.msra.mxu0 %v94_v2  ;;  %v87_v9 = vld [vmem:[#allocation5 + $0xb8] sm:$0xff]  ;;  %v86_v10 = vld [vmem:[#allocation5 + $0xb0] sm:$0xff]  ;;  %v85_v11 = vld [vmem:[#allocation5 + $0xa8] sm:$0xff]  ;;  %p443_p2 = scmp.lt.s32.totalorder %s299_s19, %s299_s19 }
  0x2a   :  { %110 = vmatprep.subr.mxu0 %v93_v3  ;;  %v84_v12 = vld [vmem:[#allocation5 + $0xa0] sm:$0xff]  ;;  %v83_v13 = vld [vmem:[#allocation5 + $0x98] sm:$0xff]  ;;  %v82_v14 = vld [vmem:[#allocation5 + $0x90] sm:$0xff]  ;;  %v100_v52 = vsub.s32 0, %v99_v51  ;;  %v104_v53 = vsub.s32 1, %v99_v51 }
  0x2b   :  { %111 = vmatpush1.msra.mxu0 %v92_v4  ;;  %v196_v15 = vld [vmem:[#allocation7 + $0x78] sm:$0xff]  ;;  %v195_v16 = vld [vmem:[#allocation7 + $0x70] sm:$0xff]  ;;  %v81_v17 = vld [vmem:[#allocation5 + $0x88] sm:$0xff] }
  0x2c   :  { %112 = vmatprep.subr.mxu0 %v91_v5  ;;  %328 = vmatpush3.msra.mxu1 %v196_v15  ;;  %v80_v18 = vld [vmem:[#allocation5 + $0x80] sm:$0xff]  ;;  %v194_v19 = vld [vmem:[#allocation7 + $0x68] sm:$0xff]  ;;  %v79_v20 = vld [vmem:[#allocation5 + $0x78] sm:$0xff] }
  0x2d   :  { %113 = vmatpush1.msra.mxu0 %v90_v6  ;;  %329 = vmatprep.subr.mxu1 %v471_v0  ;;  %v78_v21 = vld [vmem:[#allocation5 + $0x70] sm:$0xff]  ;;  %v193_v22 = vld [vmem:[#allocation7 + $0x60] sm:$0xff]  ;;  %v77_v23 = vld [vmem:[#allocation5 + $0x68] sm:$0xff] }
  0x2e   :  { %114 = vmatprep.subr.mxu0 %v89_v7  ;;  %330 = vmatpush3.msra.mxu1 %v195_v16  ;;  %v76_v24 = vld [vmem:[#allocation5 + $0x60] sm:$0xff]  ;;  %v192_v25 = vld [vmem:[#allocation7 + $0x58] sm:$0xff]  ;;  %v74_v27 = vld [vmem:[#allocation5 + $0x50] sm:$0xff] }
  0x2f   :  { %115 = vmatpush1.msra.mxu0 %v88_v8  ;;  %331 = vmatprep.subr.mxu1 %v471_v0  ;;  %v75_v26 = vld [vmem:[#allocation5 + $0x58] sm:$0xff]  ;;  %v191_v28 = vld [vmem:[#allocation7 + $0x50] sm:$0xff]  ;;  %v73_v29 = vld [vmem:[#allocation5 + $0x48] sm:$0xff] }
  0x30   :  { %116 = vmatprep.subr.mxu0 %v87_v9  ;;  %332 = vmatpush3.msra.mxu1 %v194_v19  ;;  %v72_v30 = vld [vmem:[#allocation5 + $0x40] sm:$0xff]  ;;  %v190_v31 = vld [vmem:[#allocation7 + $0x48] sm:$0xff]  ;;  %v71_v32 = vld [vmem:[#allocation5 + $0x38] sm:$0xff] }
  0x31   :  { %117 = vmatpush1.msra.mxu0 %v86_v10  ;;  %333 = vmatprep.subr.mxu1 %v471_v0  ;;  %v70_v33 = vld [vmem:[#allocation5 + $0x30] sm:$0xff]  ;;  %v189_v34 = vld [vmem:[#allocation7 + $0x40] sm:$0xff]  ;;  %v69_v35 = vld [vmem:[#allocation5 + $0x28] sm:$0xff] }
  0x32   :  { %118 = vmatprep.subr.mxu0 %v85_v11  ;;  %334 = vmatpush3.msra.mxu1 %v193_v22  ;;  %v68_v36 = vld [vmem:[#allocation5 + $0x20] sm:$0xff]  ;;  %v188_v37 = vld [vmem:[#allocation7 + $0x38] sm:$0xff]  ;;  %v66_v39 = vld [vmem:[#allocation5 + $0x10] sm:$0xff] }
  0x33   :  { %119 = vmatpush1.msra.mxu0 %v84_v12  ;;  %335 = vmatprep.subr.mxu1 %v471_v0  ;;  %v67_v38 = vld [vmem:[#allocation5 + $0x18] sm:$0xff]  ;;  %v187_v40 = vld [vmem:[#allocation7 + $0x30] sm:$0xff]  ;;  %v65_v41 = vld [vmem:[#allocation5 + $0x8] sm:$0xff] }
  0x34   :  { %120 = vmatprep.subr.mxu0 %v83_v13  ;;  %336 = vmatpush3.msra.mxu1 %v192_v25  ;;  %v64_v42 = vld [vmem:[#allocation5] sm:$0xff]  ;;  %v186_v43 = vld [vmem:[#allocation7 + $0x28] sm:$0xff]  ;;  %v63_v44 = vld [vmem:[#allocation2] sm:$0xff] }
  0x35   :  { %121 = vmatpush1.msra.mxu0 %v82_v14  ;;  %337 = vmatprep.subr.mxu1 %v471_v0  ;;  %v185_v45 = vld [vmem:[#allocation7 + $0x20] sm:$0xff]  ;;  %v184_v46 = vld [vmem:[#allocation7 + $0x18] sm:$0xff]  ;;  %v183_v47 = vld [vmem:[#allocation7 + $0x10] sm:$0xff] }
  0x36   :  { %122 = vmatprep.subr.mxu0 %v81_v17  ;;  %338 = vmatpush3.msra.mxu1 %v191_v28  ;;  %v182_v48 = vld [vmem:[#allocation7 + $0x8] sm:$0xff]  ;;  %v181_v49 = vld [vmem:[#allocation7] sm:$0xff]  ;;  %v96_v54 = vld [vmem:[%s550_s2] sm:$0x3] }
  0x37   :  { %123 = vmatpush1.msra.mxu0 %v80_v18  ;;  %339 = vmatprep.subr.mxu1 %v471_v0  ;;  %v101_v55 = vrot.slane %v96_v54, %v100_v52  ;;  %v105_v56 = vrot.slane %v96_v54, %v104_v53  ;;  %v308_v3 = vld [vmem:[%s552_s4] ss:$0 sm:$0xff]  ;;  %s438_s4 = scalar_lea.vmem %s299_s19, 128 }
  0x38   :  { %124 = vmatprep.subr.mxu0 %v79_v20  ;;  %340 = vmatpush3.msra.mxu1 %v190_v31  ;;  %v309_v5 = vld [vmem:[%s553_s5] ss:$0 sm:$0xff]  ;;  %p439_p1 = scmp.ne.s32.totalorder %s299_s19, %s438_s4  ;;  %p444_p3 = scmp.lt.s32.totalorder %s438_s4, %s438_s4 }
  0x39   :  { %125 = vmatpush1.msra.mxu0 %v78_v21  ;;  %341 = vmatprep.subr.mxu1 %v471_v0 }
  0x3a   :  { %126 = vmatprep.subr.mxu0 %v77_v23  ;;  %342 = vmatpush3.msra.mxu1 %v189_v34  ;;  %p445_p4 = por %p444_p3, %p443_p2 }
  0x3b   :  { %127 = vmatpush1.msra.mxu0 %v76_v24  ;;  %343 = vmatprep.subr.mxu1 %v471_v0 }
  0x3c   :  { %128 = vmatprep.subr.mxu0 %v75_v26  ;;  %344 = vmatpush3.msra.mxu1 %v188_v37  ;;  %p446_p5 = pnand %p445_p4, %p439_p1 }
  0x3d   :  { %129 = vmatpush1.msra.mxu0 %v74_v27  ;;  %345 = vmatprep.subr.mxu1 %v471_v0 }
  0x3e   :  { %130 = vmatprep.subr.mxu0 %v73_v29  ;;  %346 = vmatpush3.msra.mxu1 %v187_v40 }
  0x3f   :  { %131 = vmatpush1.msra.mxu0 %v72_v30  ;;  %347 = vmatprep.subr.mxu1 %v471_v0 }
  0x40   :  { %132 = vmatprep.subr.mxu0 %v71_v32  ;;  %348 = vmatpush3.msra.mxu1 %v186_v43 }
  0x41   :  { %133 = vmatpush1.msra.mxu0 %v70_v33  ;;  %349 = vmatprep.subr.mxu1 %v471_v0 }
  0x42   :  { %134 = vmatprep.subr.mxu0 %v69_v35  ;;  %350 = vmatpush3.msra.mxu1 %v185_v45 }
  0x43   :  { %135 = vmatpush1.msra.mxu0 %v68_v36  ;;  %351 = vmatprep.subr.mxu1 %v471_v0 }
  0x44   :  { %136 = vmatprep.subr.mxu0 %v67_v38  ;;  %352 = vmatpush3.msra.mxu1 %v184_v46 }
  0x45   :  { %137 = vmatpush1.msra.mxu0 %v66_v39  ;;  %353 = vmatprep.subr.mxu1 %v471_v0 }
  0x46   :  { %138 = vmatprep.subr.mxu0 %v65_v41  ;;  %354 = vmatpush3.msra.mxu1 %v183_v47 }
  0x47   :  { %139 = vmatpush1.msra.mxu0 %v64_v42  ;;  %355 = vmatprep.subr.mxu1 %v471_v0 }
  0x48   :  { %173 = vmatmul.mubr.f32.vlgmr.msra.gmra.mxu0 %v63_v44  ;;  %356 = vmatpush3.msra.mxu1 %v182_v48 }
  0x49   :  { %357 = vmatprep.subr.mxu1 %v471_v0 }
  0x4a   :  { %358 = vmatpush3.msra.mxu1 %v181_v49 }
 0x108   :  { %v174_v57 = vpop.f32.mrf.mxu0 }
 0x109   :  { %v175_v59 = vadd.f32 %v174_v57, %v101_v55 }
 0x10a   :  { %v176_v58 = vpop.f32.mrf.mxu0 }
 0x10b   :  { %v177_v60 = vadd.f32 %v176_v58, %v105_v56 }
 0x10d   :  { %v179_v61 = vsub.f32 %v175_v59, %v177_v60 }
 0x10f   :  { %v180_v62 = vmul.f32 %v179_v61, %v179_v61 }
 0x111   :  { %360 = vmatmul.mubr.f32.vlgmr.msra.gmra.mxu1 %v180_v62 }
 0x1d1   :  { %v263_v63 = vpop.f32.mrf.mxu1 }
 0x1d2   :  { %v264_v0 = vadd.f32 1e-05, %v263_v63 }
 0x1d3   :  { %v361_v1 = vpop.f32.mrf.mxu1 }
 0x1d4   :  { %372 = vrsqrt.f32 %v264_v0 }
 0x1e1   :  { %v373_v2 = vpop.eup %372 }
 0x1e2   :  { %v268_v4 = vmul.f32 %v373_v2, %v179_v61 }
 0x1e4   :  { %v276_v6 = vmul.f32 %v308_v3, %v268_v4 }
 0x1e6   :  { %v284_v7 = vadd.f32 %v309_v5, %v276_v6 }
 0x1e8   :  { %v285_v8 = vsub.f32 0.0, %v284_v7 }
 0x1ea   :  { %v286_v9 = vmul.f32 1.442695, %v285_v8 }
 0x1ec   :  { %374 = vpow2.f32 %v286_v9 }
 0x1f9   :  { %v375_v10 = vpop.eup %374 }
 0x1fa   :  { %v288_v11 = vadd.f32 1.0, %v375_v10 }
 0x1fc   :  { %376 = vrcp.f32 %v288_v11 }
 0x209   :  { %v377_v12 = vpop.eup %376 }
 0x20a   :  { %v290_v13 = vmul.f32 %v377_v12, %v284_v7 }
 0x20c   :  { %291 = vst [vmem:[#allocation8] sm:$0xff] %v290_v13 }
 0x20d   :  { %449 = shalt.err (!%p446_p5)
}
 0x20e   :  { %301 = dma.vmem_to_hbm [thread:$0]  %s299_s19, 128, %s554_s6, [#allocation4]  }
 0x20f   :  { %462 = dma.done.wait [#allocation4], 128  }
 0x210   :  { %463 = vsyncadd [#allocation4], 4294967168 }
 0x211   :  { %305 = vsyncpa [#allocation3], 1 }
 0x212   :  { %306 = vsyncpa [#allocation6], 1 }
 0x213   :  { %307 = vsyncpa [#allocation4], 1 }

</bundles_post_ra>
